<compile_context>
chip_gen: v6e
topology: v6e:2x2x1
jax: 0.10.0
libtpu: 0.0.40
codegen_flags: <defaults>
</compile_context>

<pallas_src>
import functools

import jax
import jax.numpy as jnp
from jax.experimental import pallas as pl
from jax.experimental.pallas import tpu as pltpu


def _round_up(a, b):
    return (a + b - 1) // b * b


def _patch_proj_kernel(x_ref, w_ref, b_ref, g_ref, bt_ref, o_ref, *,
                       eps, apply_norm):
    # x_ref: (TM, K) patch rows (streamed), w_ref: (K, E), b/g/bt_ref: (1, E)
    # (VMEM-resident across the grid), o_ref: (TM, E).
    y = jnp.dot(x_ref[...], w_ref[...], preferred_element_type=jnp.float32)
    y = y + b_ref[...].astype(jnp.float32)
    if apply_norm:
        # LayerNorm over E on the resident f32 tile (patch_norm=True epilogue).
        mean = jnp.mean(y, axis=-1, keepdims=True)
        yc = y - mean
        var = jnp.mean(yc * yc, axis=-1, keepdims=True)
        inv = jax.lax.rsqrt(var + eps)
        y = yc * inv * g_ref[...].astype(jnp.float32) + bt_ref[...].astype(jnp.float32)
    o_ref[...] = y.astype(o_ref.dtype)


def patch_embed_forward(x, weight, bias, gamma=None, beta=None, *,
                        patch_size, eps=1e-5, out_dtype=None,
                        tm=4096, input_buffers=3):
    """Fused PatchEmbed (+ optional LayerNorm) forward.

    x:      (B, C, H, W)                    NCHW image
    weight: (E, C, P, P)                    PyTorch Conv2d weight layout
    bias:   (E,)
    gamma/beta: (E,) LayerNorm affine (None -> no norm, PatchEmbed default)
    Returns (B, (H//P)*(W//P), E).
    """
    B, C, H, W = x.shape
    E = weight.shape[0]
    P = patch_size
    assert H % P == 0 and W % P == 0
    Hp, Wp = H // P, W // P
    num_patches = Hp * Wp
    M = B * num_patches
    K = C * P * P
    out_dtype = x.dtype if out_dtype is None else jnp.dtype(out_dtype)

    apply_norm = gamma is not None
    if not apply_norm:
        gamma = jnp.ones((E,), jnp.float32)
        beta = jnp.zeros((E,), jnp.float32)

    # --- layout glue: patchify (no compute; see TODO(synk) on fusing it) ---
    # (B, C, Hp, P, Wp, P) -> (B, Hp, Wp, C, P, P) -> (M, C*P*P); feature order
    # (c, kh, kw) matches PyTorch Conv2d weight flattening.
    xp = x.reshape(B, C, Hp, P, Wp, P)
    xp = jnp.transpose(xp, (0, 2, 4, 1, 3, 5)).reshape(M, K)

    # Conv weight (E, C, P, P) -> matmul weight (K, E); norm params as (1, E).
    w_mat = jnp.transpose(weight.reshape(E, K), (1, 0))
    b_mat = bias.reshape(1, E)
    g_mat = gamma.reshape(1, E)
    bt_mat = beta.reshape(1, E)

    # Tile the patch axis M (multiple of 8).  TM capped so 3 input buffers +
    # 2 output buffers (lane-padded) stay under v5e's 16 MiB default scoped
    # VMEM; partial last block is handled by Pallas store masking.
    TM = _round_up(min(int(tm), _round_up(M, 8)), 8)
    grid_m = pl.cdiv(M, TM)

    in_item = jnp.dtype(x.dtype).itemsize
    out_item = jnp.dtype(out_dtype).itemsize
    cost = pl.CostEstimate(
        flops=2 * M * K * E + (10 * M * E if apply_norm else 0),
        transcendentals=(M if apply_norm else 0),
        bytes_accessed=in_item * (M * K + K * E) + out_item * M * E,
    )

    # Streamed patch rows: triple-buffer when the grid actually pipelines.
    nbuf = min(int(input_buffers), grid_m)
    if nbuf > 2:
        x_spec = pl.BlockSpec((TM, K), lambda i: (i, 0),
                              pipeline_mode=pl.Buffered(nbuf))
    else:
        x_spec = pl.BlockSpec((TM, K), lambda i: (i, 0))

    kernel = functools.partial(_patch_proj_kernel, eps=float(eps),
                               apply_norm=apply_norm)

    out = pl.pallas_call(
        kernel,
        out_shape=jax.ShapeDtypeStruct((M, E), out_dtype),
        grid=(grid_m,),
        in_specs=[
            x_spec,                                       # streamed patches
            pl.BlockSpec((K, E), lambda i: (0, 0)),       # resident weight
            pl.BlockSpec((1, E), lambda i: (0, 0)),       # resident bias
            pl.BlockSpec((1, E), lambda i: (0, 0)),       # resident gamma
            pl.BlockSpec((1, E), lambda i: (0, 0)),       # resident beta
        ],
        out_specs=pl.BlockSpec((TM, E), lambda i: (i, 0)),  # full-E block: no
                                                            # post-kernel slice
        compiler_params=pltpu.CompilerParams(
            dimension_semantics=("parallel",),
        ),
        cost_estimate=cost,
    )(xp, w_mat, b_mat, g_mat, bt_mat)

    return out.reshape(B, num_patches, E)


if __name__ == "__main__":
    # Small shapes consistent with the module: img 16x16, patch 4, C=4, E=32.
    B, C, H, W = 2, 4, 16, 16
    patch_size = 4
    embed_dim = 32

    key = jax.random.PRNGKey(0)
    kx, kw, kb, kg, kb2 = jax.random.split(key, 5)

    x = jax.random.normal(kx, (B, C, H, W), dtype=jnp.float32)
    weight = jax.random.normal(
        kw, (embed_dim, C, patch_size, patch_size), dtype=jnp.float32) * 0.02
    bias = jax.random.normal(kb, (embed_dim,), dtype=jnp.float32) * 0.02
    gamma = 1.0 + 0.1 * jax.random.normal(kg, (embed_dim,), dtype=jnp.float32)
    beta = 0.1 * jax.random.normal(kb2, (embed_dim,), dtype=jnp.float32)

    # Pure-JAX reference: strided conv as patchify+matmul, then LayerNorm.
    Hp, Wp = H // patch_size, W // patch_size
    xr = x.reshape(B, C, Hp, patch_size, Wp, patch_size)
    xr = jnp.transpose(xr, (0, 2, 4, 1, 3, 5)).reshape(B, Hp * Wp, -1)
    proj_ref = xr @ weight.reshape(embed_dim, -1).T + bias[None, None, :]
    mu = proj_ref.mean(-1, keepdims=True)
    var = ((proj_ref - mu) ** 2).mean(-1, keepdims=True)
    ln_ref = (proj_ref - mu) * jax.lax.rsqrt(var + 1e-5) * gamma + beta

    # 1) PatchEmbed + fused LayerNorm (SwinTransformer default patch_norm=True).
    out = jax.block_until_ready(
        patch_embed_forward(x, weight, bias, gamma, beta, patch_size=patch_size))
    assert out.shape == (B, Hp * Wp, embed_dim)
    assert jnp.allclose(out, ln_ref, atol=1e-3, rtol=1e-3)

    # 2) Multi-step grid (TM=8 -> 4 steps) exercising Buffered(3) input pipelining.
    out_tiled = jax.block_until_ready(
        patch_embed_forward(x, weight, bias, gamma, beta,
                            patch_size=patch_size, tm=8))
    assert jnp.allclose(out_tiled, ln_ref, atol=1e-3, rtol=1e-3)

    # 3) Partial last output block (M=32, TM=24 -> masked tail rows).
    out_part = jax.block_until_ready(
        patch_embed_forward(x, weight, bias, gamma, beta,
                            patch_size=patch_size, tm=24, input_buffers=2))
    assert jnp.allclose(out_part, ln_ref, atol=1e-3, rtol=1e-3)

    # 4) norm_layer=None path (plain PatchEmbed), strict check.
    out_nonorm = jax.block_until_ready(
        patch_embed_forward(x, weight, bias, patch_size=patch_size))
    assert jnp.allclose(out_nonorm, proj_ref, atol=1e-4, rtol=1e-4)

    # 5) bf16 output store (accumulate + normalize in f32, cast on store).
    out_bf16 = jax.block_until_ready(
        patch_embed_forward(x, weight, bias, gamma, beta, patch_size=patch_size,
                            out_dtype=jnp.bfloat16, tm=8))
    assert out_bf16.dtype == jnp.bfloat16
    assert jnp.allclose(out_bf16.astype(jnp.float32), ln_ref, atol=5e-2, rtol=5e-2)

    print("KERNEL_OK")
</pallas_src>

<mosaic_0001>
module attributes {stable_mosaic.version = 11 : i64} {
  func.func @_patch_proj_kernel(%arg0: i32, %arg1: memref<32x64xf32, #tpu.memory_space<vmem>>, %arg2: memref<64x32xf32, #tpu.memory_space<vmem>>, %arg3: memref<1x32xf32, #tpu.memory_space<vmem>>, %arg4: memref<1x32xf32, #tpu.memory_space<vmem>>, %arg5: memref<1x32xf32, #tpu.memory_space<vmem>>, %arg6: memref<32x32xf32, #tpu.memory_space<vmem>>) attributes {dimension_semantics = [#tpu.dimension_semantics<parallel>], iteration_bounds = array<i64: 1>, scalar_prefetch = 0 : i64, scratch_operands = 0 : i64, tpu.core_type = #tpu.core_type<tc>, window_params = [{transform_indices = @transform_0, window_bounds = array<i64: 32, 64>}, {pipeline_mode = #tpu.pipeline_mode<synchronous>, transform_indices = @transform_1, window_bounds = array<i64: 64, 32>}, {pipeline_mode = #tpu.pipeline_mode<synchronous>, transform_indices = @transform_2, window_bounds = array<i64: 1, 32>}, {pipeline_mode = #tpu.pipeline_mode<synchronous>, transform_indices = @transform_3, window_bounds = array<i64: 1, 32>}, {pipeline_mode = #tpu.pipeline_mode<synchronous>, transform_indices = @transform_4, window_bounds = array<i64: 1, 32>}, {transform_indices = @transform_5, window_bounds = array<i64: 32, 32>}]} {
    %c0 = arith.constant 0 : index
    %c0_0 = arith.constant 0 : index
    %0 = vector.load %arg1[%c0, %c0_0] : memref<32x64xf32, #tpu.memory_space<vmem>>, vector<32x64xf32>
    %c0_1 = arith.constant 0 : index
    %c0_2 = arith.constant 0 : index
    %1 = vector.load %arg2[%c0_1, %c0_2] : memref<64x32xf32, #tpu.memory_space<vmem>>, vector<64x32xf32>
    %cst = arith.constant dense<0.000000e+00> : vector<32x32xf32>
    %2 = tpu.matmul %0, %1, %cst {dimension_numbers = #tpu.dot_dimension_numbers<[1], [0], [0], [1], [0, 0, 1, 1], [], []>} : vector<32x64xf32>, vector<64x32xf32>, vector<32x32xf32> -> vector<32x32xf32>
    %c0_3 = arith.constant 0 : index
    %c0_4 = arith.constant 0 : index
    %3 = vector.load %arg3[%c0_3, %c0_4] : memref<1x32xf32, #tpu.memory_space<vmem>>, vector<1x32xf32>
    %4 = vector.broadcast %3 : vector<1x32xf32> to vector<32x32xf32>
    %5 = arith.addf %2, %4 : vector<32x32xf32>
    %cst_5 = arith.constant dense<0.000000e+00> : vector<32xf32>
    %6 = vector.multi_reduction <add>, %5, %cst_5 [1] : vector<32x32xf32> to vector<32xf32>
    %7 = vector.shape_cast %6 : vector<32xf32> to vector<32x1xf32>
    %cst_6 = arith.constant 3.200000e+01 : f32
    %8 = vector.broadcast %cst_6 : f32 to vector<32x1xf32>
    %9 = arith.divf %7, %8 : vector<32x1xf32>
    %10 = vector.broadcast %9 : vector<32x1xf32> to vector<32x32xf32>
    %11 = arith.subf %5, %10 : vector<32x32xf32>
    %12 = arith.mulf %11, %11 : vector<32x32xf32>
    %cst_7 = arith.constant dense<0.000000e+00> : vector<32xf32>
    %13 = vector.multi_reduction <add>, %12, %cst_7 [1] : vector<32x32xf32> to vector<32xf32>
    %14 = vector.shape_cast %13 : vector<32xf32> to vector<32x1xf32>
    %cst_8 = arith.constant 3.200000e+01 : f32
    %15 = vector.broadcast %cst_8 : f32 to vector<32x1xf32>
    %16 = arith.divf %14, %15 : vector<32x1xf32>
    %cst_9 = arith.constant 9.99999974E-6 : f32
    %17 = vector.broadcast %cst_9 : f32 to vector<32x1xf32>
    %18 = arith.addf %16, %17 : vector<32x1xf32>
    %19 = math.rsqrt %18 : vector<32x1xf32>
    %20 = vector.broadcast %19 : vector<32x1xf32> to vector<32x32xf32>
    %21 = arith.mulf %11, %20 : vector<32x32xf32>
    %c0_10 = arith.constant 0 : index
    %c0_11 = arith.constant 0 : index
    %22 = vector.load %arg4[%c0_10, %c0_11] : memref<1x32xf32, #tpu.memory_space<vmem>>, vector<1x32xf32>
    %23 = vector.broadcast %22 : vector<1x32xf32> to vector<32x32xf32>
    %24 = arith.mulf %21, %23 : vector<32x32xf32>
    %c0_12 = arith.constant 0 : index
    %c0_13 = arith.constant 0 : index
    %25 = vector.load %arg5[%c0_12, %c0_13] : memref<1x32xf32, #tpu.memory_space<vmem>>, vector<1x32xf32>
    %26 = vector.broadcast %25 : vector<1x32xf32> to vector<32x32xf32>
    %27 = arith.addf %24, %26 : vector<32x32xf32>
    %c0_14 = arith.constant 0 : index
    %c0_15 = arith.constant 0 : index
    %28 = vector.load %arg6[%c0_14, %c0_15] : memref<32x32xf32, #tpu.memory_space<vmem>>, vector<32x32xf32>
    tpu.vector_store %arg6[%c0_14, %c0_15], %27 {strides = array<i32>} : memref<32x32xf32, #tpu.memory_space<vmem>>, vector<32x32xf32>,
    return
  }
  func.func @transform_0(%arg0: i32) -> (i32, i32) {
    %c0_i32 = arith.constant 0 : i32
    %c0_i32_0 = arith.constant 0 : i32
    return %arg0, %c0_i32 : i32, i32
  }
  func.func @transform_1(%arg0: i32) -> (i32, i32) {
    %c0_i32 = arith.constant 0 : i32
    %c0_i32_0 = arith.constant 0 : i32
    %c0_i32_1 = arith.constant 0 : i32
    return %c0_i32, %c0_i32_0 : i32, i32
  }
  func.func @transform_2(%arg0: i32) -> (i32, i32) {
    %c0_i32 = arith.constant 0 : i32
    %c0_i32_0 = arith.constant 0 : i32
    %c0_i32_1 = arith.constant 0 : i32
    return %c0_i32, %c0_i32_0 : i32, i32
  }
  func.func @transform_3(%arg0: i32) -> (i32, i32) {
    %c0_i32 = arith.constant 0 : i32
    %c0_i32_0 = arith.constant 0 : i32
    %c0_i32_1 = arith.constant 0 : i32
    return %c0_i32, %c0_i32_0 : i32, i32
  }
  func.func @transform_4(%arg0: i32) -> (i32, i32) {
    %c0_i32 = arith.constant 0 : i32
    %c0_i32_0 = arith.constant 0 : i32
    %c0_i32_1 = arith.constant 0 : i32
    return %c0_i32, %c0_i32_0 : i32, i32
  }
  func.func @transform_5(%arg0: i32) -> (i32, i32) {
    %c0_i32 = arith.constant 0 : i32
    %c0_i32_0 = arith.constant 0 : i32
    return %arg0, %c0_i32 : i32, i32
  }
}

</mosaic_0001>

<bundles_post_ra>
// kernel: tpu_custom_call.1
= control target key start
LH: loop header
LB: loop body
LE: loop exit
PB: predicated region body
PF: predicated region fallthrough
CT: control target
= control target key end

     0   :  { %s417_s0 = inlined_call_operand.vmem [shape: f32[32,64], index: 0, kind: input, shape index: {}]   ;;  %s418_s1 = inlined_call_operand.vmem [shape: f32[64,32], index: 1, kind: input, shape index: {}]   ;;  %s419_s2 = inlined_call_operand.vmem [shape: f32[1,32], index: 2, kind: input, shape index: {}]   ;;  %s420_s3 = inlined_call_operand.vmem [shape: f32[1,32], index: 3, kind: input, shape index: {}]   ;;  %s421_s4 = inlined_call_operand.vmem [shape: f32[1,32], index: 4, kind: input, shape index: {}]   ;;  %s422_s5 = inlined_call_operand.hbm [shape: f32[32,32], index: 5, kind: output, shape index: {}]  }
   0x1   :  { %v32_v0 = vld [vmem:[%s418_s1 + $0x38] sm:$0xff]  ;;  %v31_v1 = vld [vmem:[%s418_s1 + $0x30] sm:$0xff]  ;;  %v30_v2 = vld [vmem:[%s418_s1 + $0x28] sm:$0xff] }
   0x2   :  { %253 = vmatprep.subr.mxu0 %v32_v0  ;;  %275 = vmatprep.subr.mxu1 %v32_v0  ;;  %v29_v3 = vld [vmem:[%s418_s1 + $0x20] sm:$0xff] }
   0x3   :  { %254 = vmatpush3.msra.mxu0 %v32_v0  ;;  %283 = vmatpush3.msra.mxu1 %v32_v0 }
   0x4   :  { %255 = vmatprep.subr.mxu0 %v31_v1  ;;  %276 = vmatprep.subr.mxu1 %v31_v1 }
   0x5   :  { %256 = vmatpush3.msra.mxu0 %v31_v1  ;;  %284 = vmatpush3.msra.mxu1 %v31_v1 }
   0x6   :  { %10 = vsyncpa [#allocation3], 0  ;;  %257 = vmatprep.subr.mxu0 %v30_v2  ;;  %277 = vmatprep.subr.mxu1 %v30_v2  ;;  %v28_v4 = vld [vmem:[%s418_s1 + $0x18] sm:$0xff]  ;;  %v27_v5 = vld [vmem:[%s418_s1 + $0x10] sm:$0xff]  ;;  %vm40_vm0 = vcmask 523264   ;;  %vm138_vm1 = vcmask 261120  }
   0x7   :  { %258 = vmatpush3.msra.mxu0 %v30_v2  ;;  %285 = vmatpush3.msra.mxu1 %v30_v2  ;;  %v26_v6 = vld [vmem:[%s418_s1 + $0x8] sm:$0xff]  ;;  %v25_v7 = vld [vmem:[%s418_s1] sm:$0xff]  ;;  %v23_v9 = vld [vmem:[%s417_s0 + $0x10] sm:$0xff] }
   0x8   :  { %259 = vmatprep.subr.mxu0 %v29_v3  ;;  %278 = vmatprep.subr.mxu1 %v29_v3  ;;  %v21_v8 = vld [vmem:[%s417_s0] sm:$0xff]  ;;  %v22_v10 = vld [vmem:[%s417_s0 + $0x8] sm:$0xff]  ;;  %v24_v11 = vld [vmem:[%s417_s0 + $0x18] sm:$0xff] }
   0x9   :  { %260 = vmatpush3.msra.mxu0 %v29_v3  ;;  %286 = vmatpush3.msra.mxu1 %v29_v3  ;;  %v234_v14 = vld [vmem:[%s419_s2] ss:$0 sm:$0xff] }
   0xa   :  { %261 = vmatprep.subr.mxu0 %v28_v4  ;;  %279 = vmatprep.subr.mxu1 %v28_v4  ;;  %v239_v58 = vld [vmem:[%s420_s3] ss:$0 sm:$0xff]  ;;  %s324_s3 = smov [#allocation2]  }
   0xb   :  { %262 = vmatpush3.msra.mxu0 %v28_v4  ;;  %287 = vmatpush3.msra.mxu1 %v28_v4  ;;  %v240_v60 = vld [vmem:[%s421_s4] ss:$0 sm:$0xff]  ;;  %s223_s20 = sshll.u32 %s324_s3, 4  ;;  %s224_s20 = int_to_ptr.vmem [resolvable:$true] %s223_s20 }
   0xc   :  { %263 = vmatprep.subr.mxu0 %v27_v5  ;;  %280 = vmatprep.subr.mxu1 %v27_v5  ;;  %s302_s4 = scalar_lea.vmem %s224_s20, 512  ;;  %p307_p1 = scmp.lt.s32.totalorder %s224_s20, %s224_s20 }
   0xd   :  { %264 = vmatpush3.msra.mxu0 %v27_v5  ;;  %288 = vmatpush3.msra.mxu1 %v27_v5  ;;  %p303_p0 = scmp.ne.s32.totalorder %s224_s20, %s302_s4  ;;  %p308_p2 = scmp.lt.s32.totalorder %s302_s4, %s302_s4 }
   0xe   :  { %265 = vmatprep.subr.mxu0 %v26_v6  ;;  %281 = vmatprep.subr.mxu1 %v26_v6 }
   0xf   :  { %266 = vmatpush3.msra.mxu0 %v26_v6  ;;  %289 = vmatpush3.msra.mxu1 %v26_v6  ;;  %p309_p3 = por %p308_p2, %p307_p1 }
  0x10   :  { %267 = vmatprep.subr.mxu0 %v25_v7  ;;  %282 = vmatprep.subr.mxu1 %v25_v7 }
  0x11   :  { %268 = vmatpush3.msra.mxu0 %v25_v7  ;;  %290 = vmatpush3.msra.mxu1 %v25_v7  ;;  %p310_p4 = pnand %p309_p3, %p303_p0 }
  0x12   :  { %269 = vmatprep.mubr.msk.f32.mxu0 %vm40_vm0, %v21_v8  ;;  %272 = vmatprep.mubr.msk.f32.mxu1 %vm40_vm0, %v23_v9 }
  0x13   :  { %270 = vmatmul.mubr.msk.f32.vlgmr.msra.gmra.mxu0 %vm40_vm0, %v22_v10  ;;  %273 = vmatmul.mubr.msk.f32.vlgmr.msra.gmra.mxu1 %vm40_vm0, %v24_v11 }
  0xd3   :  { %v271_v12 = vpop.f32.mrf.mxu0  ;;  %v274_v13 = vpop.f32.mrf.mxu1 }
  0xd4   :  { %v125_v19 = vadd.f32 %v271_v12, %v234_v14  ;;  %v135_v20 = vadd.f32 %v274_v13, %v234_v14 }
  0xd5   :  { %v119_v15 = vpop.f32.mrf.mxu0  ;;  %v129_v16 = vpop.f32.mrf.mxu1 }
  0xd6   :  { %v120_v17 = vadd.f32 %v234_v14, %v119_v15  ;;  %v130_v18 = vadd.f32 %v234_v14, %v129_v16  ;;  %v148_v23 = vsel %vm138_vm1, %v135_v20, 0.0  ;;  %v142_v24 = vsel %vm138_vm1, %v125_v19, 0.0 }
  0xd8   :  { %v145_v21 = vsel %vm138_vm1, %v130_v18, 0.0  ;;  %v139_v22 = vsel %vm138_vm1, %v120_v17, 0.0 }
  0xd9   :  { %146 = vadd.xlane.f32.xlu1 %v145_v21  ;;  %140 = vadd.xlane.f32.xlu0 %v139_v22 }
  0xdd   :  { %149 = vadd.xlane.f32.xlu1 %v148_v23  ;;  %143 = vadd.xlane.f32.xlu0 %v142_v24 }
 0x162   :  { %v147_v25 = vpop.xlane.xlu1 %146  ;;  %v141_v26 = vpop.xlane.xlu0 %140 }
 0x163   :  { %v154_v27 = vmul.f32 0.03125, %v147_v25  ;;  %v152_v28 = vmul.f32 0.03125, %v141_v26 }
 0x165   :  { %v158_v29 = vsub.f32 %v130_v18, %v154_v27  ;;  %v156_v30 = vsub.f32 %v120_v17, %v152_v28 }
 0x166   :  { %v150_v31 = vpop.xlane.xlu1 %149  ;;  %v144_v32 = vpop.xlane.xlu0 %143 }
 0x167   :  { %v155_v33 = vmul.f32 0.03125, %v150_v31  ;;  %v153_v34 = vmul.f32 0.03125, %v144_v32  ;;  %v160_v35 = vmul.f32 %v156_v30, %v156_v30  ;;  %v162_v39 = vmul.f32 %v158_v29, %v158_v29 }
 0x169   :  { %v159_v36 = vsub.f32 %v135_v20, %v155_v33  ;;  %v157_v37 = vsub.f32 %v125_v19, %v153_v34  ;;  %v164_v38 = vsel %vm138_vm1, %v160_v35, 0.0  ;;  %v170_v41 = vsel %vm138_vm1, %v162_v39, 0.0 }
 0x16a   :  { %165 = vadd.xlane.f32.xlu0 %v164_v38 }
 0x16b   :  { %v161_v40 = vmul.f32 %v157_v37, %v157_v37  ;;  %v163_v43 = vmul.f32 %v159_v36, %v159_v36 }
 0x16d   :  { %v167_v42 = vsel %vm138_vm1, %v161_v40, 0.0  ;;  %v173_v44 = vsel %vm138_vm1, %v163_v43, 0.0 }
 0x16e   :  { %171 = vadd.xlane.f32.xlu0 %v170_v41  ;;  %168 = vadd.xlane.f32.xlu1 %v167_v42 }
 0x172   :  { %174 = vadd.xlane.f32.xlu1 %v173_v44 }
 0x1f3   :  { %v166_v45 = vpop.xlane.xlu0 %165 }
 0x1f4   :  { %v176_v46 = vmul.f32 0.03125, %v166_v45 }
 0x1f6   :  { %v180_v47 = vadd.f32 1e-05, %v176_v46 }
 0x1f7   :  { %v169_v48 = vpop.xlane.xlu1 %168  ;;  %v172_v49 = vpop.xlane.xlu0 %171 }
 0x1f8   :  { %294 = vrsqrt.f32 %v180_v47  ;;  %v177_v50 = vmul.f32 0.03125, %v169_v48  ;;  %v178_v51 = vmul.f32 0.03125, %v172_v49 }
 0x1fa   :  { %v181_v52 = vadd.f32 1e-05, %v177_v50  ;;  %v182_v53 = vadd.f32 1e-05, %v178_v51 }
 0x1fb   :  { %v175_v54 = vpop.xlane.xlu1 %174 }
 0x1fc   :  { %296 = vrsqrt.f32 %v181_v52  ;;  %v179_v55 = vmul.f32 0.03125, %v175_v54 }
 0x1fd   :  { %298 = vrsqrt.f32 %v182_v53 }
 0x1fe   :  { %v183_v56 = vadd.f32 1e-05, %v179_v55 }
 0x200   :  { %300 = vrsqrt.f32 %v183_v56 }
 0x205   :  { %v295_v57 = vpop.eup %294 }
 0x206   :  { %v188_v59 = vmul.f32 %v295_v57, %v156_v30 }
 0x208   :  { %v199_v61 = vmul.f32 %v239_v58, %v188_v59 }
 0x209   :  { %v297_v62 = vpop.eup %296 }
 0x20a   :  { %v299_v63 = vpop.eup %298  ;;  %v189_v0 = vmul.f32 %v297_v62, %v157_v37  ;;  %v210_v1 = vadd.f32 %v240_v60, %v199_v61 }
 0x20b   :  { %v190_v2 = vmul.f32 %v299_v63, %v158_v29 }
 0x20c   :  { %v200_v3 = vmul.f32 %v239_v58, %v189_v0  ;;  %214 = vst.msk [vmem:[#allocation2] sm:$0xff] %vm138_vm1, %v210_v1 }
 0x20d   :  { %v301_v4 = vpop.eup %300  ;;  %v201_v5 = vmul.f32 %v239_v58, %v190_v2 }
 0x20e   :  { %v191_v6 = vmul.f32 %v301_v4, %v159_v36  ;;  %v211_v7 = vadd.f32 %v240_v60, %v200_v3 }
 0x20f   :  { %v212_v8 = vadd.f32 %v240_v60, %v201_v5 }
 0x210   :  { %v202_v9 = vmul.f32 %v239_v58, %v191_v6  ;;  %215 = vst.msk [vmem:[#allocation2 + $0x8] sm:$0xff] %vm138_vm1, %v211_v7 }
 0x211   :  { %216 = vst.msk [vmem:[#allocation2 + $0x10] sm:$0xff] %vm138_vm1, %v212_v8 }
 0x212   :  { %v213_v10 = vadd.f32 %v240_v60, %v202_v9 }
 0x214   :  { %217 = vst.msk [vmem:[#allocation2 + $0x18] sm:$0xff] %vm138_vm1, %v213_v10 }
 0x215   :  { %313 = shalt.err (!%p310_p4)
}
 0x216   :  { %s325_s21 = smov 128   ;;  %s326_s22 = smov 8  }
 0x217   :  { %229 = dma.vmem_to_hbm [thread:$0]  %s224_s20, 512, %s422_s5, [#allocation3], %s325_s21, %s325_s21, %s326_s22  }
 0x218   :  { %322 = dma.done.wait [#allocation3], 512  }
 0x219   :  { %323 = vsyncadd [#allocation3], 4294966784 }
 0x21a   :  { %233 = vsyncpa [#allocation3], 1 }

</bundles_post_ra>
